<compile_context>
chip_gen: v6e
topology: v6e:2x2x1
jax: 0.10.0
libtpu: 0.0.40
codegen_flags: <defaults>
</compile_context>

<pallas_src>
import functools

import jax
import jax.numpy as jnp
from jax.experimental import pallas as pl
from jax.experimental.pallas import tpu as pltpu

_LANE = 128
_SUBLANE = 8


def _round_up(x, m):
    return (x + m - 1) // m * m


# ----------------------------------------------------------------------------
# Pallas kernel: fused 3-layer MLP (bf16 matmuls, f32 accumulation/epilogue)
# ----------------------------------------------------------------------------
def _qnet_kernel(x_ref, w1_ref, w2_ref, w3_ref, b_ref, out_ref,
                 *, hidden_pad, out_pad):
    x = x_ref[...]                      # (TILE_B, in_pad)  bf16
    b = b_ref[...]                      # (8, max(hidden_pad, out_pad)) f32

    # fc1 + relu
    h1 = jnp.dot(x, w1_ref[...], preferred_element_type=jnp.float32)
    h1 = jnp.maximum(h1 + b[0:1, :hidden_pad], 0.0)

    # fc2 + relu
    h2 = jnp.dot(h1.astype(jnp.bfloat16), w2_ref[...],
                 preferred_element_type=jnp.float32)
    h2 = jnp.maximum(h2 + b[1:2, :hidden_pad], 0.0)

    # fc3 (Q head) — lane-dense (out_pad is a multiple of 128) f32 store
    q = jnp.dot(h2.astype(jnp.bfloat16), w3_ref[...],
                preferred_element_type=jnp.float32)
    out_ref[...] = q + b[2:3, :out_pad]


# ----------------------------------------------------------------------------
# Parameter construction (mimics torch.nn.Linear default init).
# Weights stored transposed vs. PyTorch: (in_features, out_features).
# ----------------------------------------------------------------------------
def make_qnetwork_params(key, belief_dim, latent_dim, action_dim, hidden_dim,
                         num_agents):
    input_dim = belief_dim + latent_dim + action_dim * num_agents
    dims = [(input_dim, hidden_dim), (hidden_dim, hidden_dim),
            (hidden_dim, action_dim)]
    names = ["fc1", "fc2", "fc3"]
    params = {}
    for name, (fi, fo), k in zip(names, dims, jax.random.split(key, 3)):
        kw, kb = jax.random.split(k)
        bound = 1.0 / (fi ** 0.5)
        w = jax.random.uniform(kw, (fi, fo), jnp.float32, -bound, bound)
        b = jax.random.uniform(kb, (fo,), jnp.float32, -bound, bound)
        params[name] = (w, b)
    return params


def _pack_params(params, in_pad, hidden_pad, out_pad):
    """Zero-pad weights to 128-multiples (bf16) and pack biases into one array."""
    (w1, b1), (w2, b2), (w3, b3) = params["fc1"], params["fc2"], params["fc3"]

    def pad2(w, rows, cols):
        return jnp.pad(w, ((0, rows - w.shape[0]), (0, cols - w.shape[1])))

    w1p = pad2(w1, in_pad, hidden_pad).astype(jnp.bfloat16)
    w2p = pad2(w2, hidden_pad, hidden_pad).astype(jnp.bfloat16)
    w3p = pad2(w3, hidden_pad, out_pad).astype(jnp.bfloat16)

    bw = max(hidden_pad, out_pad)
    bias = jnp.zeros((_SUBLANE, bw), jnp.float32)
    bias = bias.at[0, :b1.shape[0]].set(b1)
    bias = bias.at[1, :b2.shape[0]].set(b2)
    bias = bias.at[2, :b3.shape[0]].set(b3)
    return w1p, w2p, w3p, bias


# ----------------------------------------------------------------------------
# Forward wrapper (mirrors QNetwork.forward semantics).
# ----------------------------------------------------------------------------
def qnetwork_forward(params, belief, latent, neighbor_actions,
                     *, action_dim, hidden_dim):
    # torch's .squeeze(0): drop leading dim only if it is size 1
    if belief.ndim == 3 and belief.shape[0] == 1:
        belief = jnp.squeeze(belief, axis=0)
    if latent.ndim == 3 and latent.shape[0] == 1:
        latent = jnp.squeeze(latent, axis=0)

    combined = jnp.concatenate([belief, latent, neighbor_actions],
                               axis=1).astype(jnp.float32)
    batch, in_dim = combined.shape

    in_pad = _round_up(in_dim, _LANE)
    hid_pad = _round_up(hidden_dim, _LANE)
    out_pad = _round_up(action_dim, _LANE)

    # Batch tile: sublane-aligned, capped at 256 rows (full MXU M at scale,
    # minimal padding waste at tiny batches).
    tile_b = min(_round_up(batch, _SUBLANE), 256)
    b_pad = _round_up(batch, tile_b)

    x = jnp.pad(combined,
                ((0, b_pad - batch), (0, in_pad - in_dim))).astype(jnp.bfloat16)
    w1p, w2p, w3p, bias = _pack_params(params, in_pad, hid_pad, out_pad)
    bw = bias.shape[1]

    kernel = functools.partial(_qnet_kernel, hidden_pad=hid_pad,
                               out_pad=out_pad)

    # Explicit VMEM budget: double-buffered x/out tiles + resident weights,
    # clamped so the same sizing is valid on v7x (64 MiB physical per TC).
    vmem_est = (2 * (tile_b * in_pad * 2 + tile_b * out_pad * 4)
                + 2 * (w1p.size * 2 + w2p.size * 2 + w3p.size * 2
                       + bias.size * 4))
    vmem_limit = int(min(max(2 * vmem_est, 32 << 20), 64 << 20))

    out = pl.pallas_call(
        kernel,
        out_shape=jax.ShapeDtypeStruct((b_pad, out_pad), jnp.float32),
        grid=(b_pad // tile_b,),
        in_specs=[
            pl.BlockSpec((tile_b, in_pad), lambda i: (i, 0)),     # x: tiled
            pl.BlockSpec((in_pad, hid_pad), lambda i: (0, 0)),    # w1: resident
            pl.BlockSpec((hid_pad, hid_pad), lambda i: (0, 0)),   # w2: resident
            pl.BlockSpec((hid_pad, out_pad), lambda i: (0, 0)),   # w3: resident
            pl.BlockSpec((_SUBLANE, bw), lambda i: (0, 0)),       # packed biases
        ],
        out_specs=pl.BlockSpec((tile_b, out_pad), lambda i: (i, 0)),
        compiler_params=pltpu.CompilerParams(
            dimension_semantics=("parallel",),
            vmem_limit_bytes=vmem_limit,
        ),
    )(x, w1p, w2p, w3p, bias)

    return out[:batch, :action_dim]


# ----------------------------------------------------------------------------
# Pure-JAX reference (same bf16-inputs / f32-accum numerics) for checking.
# ----------------------------------------------------------------------------
def _reference(params, combined):
    (w1, b1), (w2, b2), (w3, b3) = params["fc1"], params["fc2"], params["fc3"]
    h = combined.astype(jnp.bfloat16)
    h = jax.nn.relu(jnp.dot(h, w1.astype(jnp.bfloat16),
                            preferred_element_type=jnp.float32) + b1)
    h = jax.nn.relu(jnp.dot(h.astype(jnp.bfloat16), w2.astype(jnp.bfloat16),
                            preferred_element_type=jnp.float32) + b2)
    return jnp.dot(h.astype(jnp.bfloat16), w3.astype(jnp.bfloat16),
                   preferred_element_type=jnp.float32) + b3


if __name__ == "__main__":
    # Small shapes consistent with the module.
    batch = 2
    belief_dim = 5
    latent_dim = 8
    action_dim = 3
    hidden_dim = 32
    num_agents = 2

    key = jax.random.PRNGKey(0)
    kp, kb, kl, ka = jax.random.split(key, 4)

    params = make_qnetwork_params(kp, belief_dim, latent_dim, action_dim,
                                  hidden_dim, num_agents)

    # belief arrives 3-D (leading singleton) to exercise the squeeze path.
    belief = jax.random.uniform(kb, (1, batch, belief_dim), dtype=jnp.float32)
    latent = jax.random.uniform(kl, (batch, latent_dim), dtype=jnp.float32)
    neighbor_actions = jax.random.uniform(
        ka, (batch, action_dim * num_agents), dtype=jnp.float32)

    q = qnetwork_forward(params, belief, latent, neighbor_actions,
                         action_dim=action_dim, hidden_dim=hidden_dim)
    jax.block_until_ready(q)

    # Correctness check against a pure-JAX reference with matching numerics.
    combined = jnp.concatenate(
        [jnp.squeeze(belief, axis=0), latent, neighbor_actions], axis=1)
    q_ref = _reference(params, combined)

    assert q.shape == (batch, action_dim)
    assert jnp.allclose(q, q_ref, atol=1e-3, rtol=1e-3)

    print("KERNEL_OK")
</pallas_src>

<mosaic_0001>
module attributes {stable_mosaic.version = 11 : i64} {
  func.func @_qnet_kernel(%arg0: i32, %arg1: memref<8x128xbf16, #tpu.memory_space<vmem>>, %arg2: memref<128x128xbf16, #tpu.memory_space<vmem>>, %arg3: memref<128x128xbf16, #tpu.memory_space<vmem>>, %arg4: memref<128x128xbf16, #tpu.memory_space<vmem>>, %arg5: memref<8x128xf32, #tpu.memory_space<vmem>>, %arg6: memref<8x128xf32, #tpu.memory_space<vmem>>) attributes {dimension_semantics = [#tpu.dimension_semantics<parallel>], iteration_bounds = array<i64: 1>, scalar_prefetch = 0 : i64, scratch_operands = 0 : i64, tpu.core_type = #tpu.core_type<tc>, window_params = [{transform_indices = @transform_0, window_bounds = array<i64: 8, 128>}, {pipeline_mode = #tpu.pipeline_mode<synchronous>, transform_indices = @transform_1, window_bounds = array<i64: 128, 128>}, {pipeline_mode = #tpu.pipeline_mode<synchronous>, transform_indices = @transform_2, window_bounds = array<i64: 128, 128>}, {pipeline_mode = #tpu.pipeline_mode<synchronous>, transform_indices = @transform_3, window_bounds = array<i64: 128, 128>}, {pipeline_mode = #tpu.pipeline_mode<synchronous>, transform_indices = @transform_4, window_bounds = array<i64: 8, 128>}, {transform_indices = @transform_5, window_bounds = array<i64: 8, 128>}]} {
    %c0 = arith.constant 0 : index
    %c0_0 = arith.constant 0 : index
    %0 = vector.load %arg1[%c0, %c0_0] : memref<8x128xbf16, #tpu.memory_space<vmem>>, vector<8x128xbf16>
    %c0_1 = arith.constant 0 : index
    %c0_2 = arith.constant 0 : index
    %1 = vector.load %arg5[%c0_1, %c0_2] : memref<8x128xf32, #tpu.memory_space<vmem>>, vector<8x128xf32>
    %c0_3 = arith.constant 0 : index
    %c0_4 = arith.constant 0 : index
    %2 = vector.load %arg2[%c0_3, %c0_4] : memref<128x128xbf16, #tpu.memory_space<vmem>>, vector<128x128xbf16>
    %cst = arith.constant dense<0.000000e+00> : vector<8x128xf32>
    %3 = tpu.matmul %0, %2, %cst {dimension_numbers = #tpu.dot_dimension_numbers<[1], [0], [0], [1], [0, 0, 1, 1], [], []>} : vector<8x128xbf16>, vector<128x128xbf16>, vector<8x128xf32> -> vector<8x128xf32>
    %4 = vector.extract_strided_slice %1 {offsets = [0, 0], sizes = [1, 128], strides = [1, 1]} : vector<8x128xf32> to vector<1x128xf32>
    %5 = vector.broadcast %4 : vector<1x128xf32> to vector<8x128xf32>
    %6 = arith.addf %3, %5 : vector<8x128xf32>
    %cst_5 = arith.constant 0.000000e+00 : f32
    %7 = vector.broadcast %cst_5 : f32 to vector<8x128xf32>
    %8 = arith.maximumf %6, %7 : vector<8x128xf32>
    %9 = arith.truncf %8 : vector<8x128xf32> to vector<8x128xbf16>
    %c0_6 = arith.constant 0 : index
    %c0_7 = arith.constant 0 : index
    %10 = vector.load %arg3[%c0_6, %c0_7] : memref<128x128xbf16, #tpu.memory_space<vmem>>, vector<128x128xbf16>
    %cst_8 = arith.constant dense<0.000000e+00> : vector<8x128xf32>
    %11 = tpu.matmul %9, %10, %cst_8 {dimension_numbers = #tpu.dot_dimension_numbers<[1], [0], [0], [1], [0, 0, 1, 1], [], []>} : vector<8x128xbf16>, vector<128x128xbf16>, vector<8x128xf32> -> vector<8x128xf32>
    %12 = vector.extract_strided_slice %1 {offsets = [1, 0], sizes = [1, 128], strides = [1, 1]} : vector<8x128xf32> to vector<1x128xf32>
    %13 = vector.broadcast %12 : vector<1x128xf32> to vector<8x128xf32>
    %14 = arith.addf %11, %13 : vector<8x128xf32>
    %cst_9 = arith.constant 0.000000e+00 : f32
    %15 = vector.broadcast %cst_9 : f32 to vector<8x128xf32>
    %16 = arith.maximumf %14, %15 : vector<8x128xf32>
    %17 = arith.truncf %16 : vector<8x128xf32> to vector<8x128xbf16>
    %c0_10 = arith.constant 0 : index
    %c0_11 = arith.constant 0 : index
    %18 = vector.load %arg4[%c0_10, %c0_11] : memref<128x128xbf16, #tpu.memory_space<vmem>>, vector<128x128xbf16>
    %cst_12 = arith.constant dense<0.000000e+00> : vector<8x128xf32>
    %19 = tpu.matmul %17, %18, %cst_12 {dimension_numbers = #tpu.dot_dimension_numbers<[1], [0], [0], [1], [0, 0, 1, 1], [], []>} : vector<8x128xbf16>, vector<128x128xbf16>, vector<8x128xf32> -> vector<8x128xf32>
    %20 = vector.extract_strided_slice %1 {offsets = [2, 0], sizes = [1, 128], strides = [1, 1]} : vector<8x128xf32> to vector<1x128xf32>
    %21 = vector.broadcast %20 : vector<1x128xf32> to vector<8x128xf32>
    %22 = arith.addf %19, %21 : vector<8x128xf32>
    %c0_13 = arith.constant 0 : index
    %c0_14 = arith.constant 0 : index
    %23 = vector.load %arg6[%c0_13, %c0_14] : memref<8x128xf32, #tpu.memory_space<vmem>>, vector<8x128xf32>
    tpu.vector_store %arg6[%c0_13, %c0_14], %22 {strides = array<i32>} : memref<8x128xf32, #tpu.memory_space<vmem>>, vector<8x128xf32>,
    return
  }
  func.func @transform_0(%arg0: i32) -> (i32, i32) {
    %c0_i32 = arith.constant 0 : i32
    %c0_i32_0 = arith.constant 0 : i32
    return %arg0, %c0_i32 : i32, i32
  }
  func.func @transform_1(%arg0: i32) -> (i32, i32) {
    %c0_i32 = arith.constant 0 : i32
    %c0_i32_0 = arith.constant 0 : i32
    %c0_i32_1 = arith.constant 0 : i32
    return %c0_i32, %c0_i32_0 : i32, i32
  }
  func.func @transform_2(%arg0: i32) -> (i32, i32) {
    %c0_i32 = arith.constant 0 : i32
    %c0_i32_0 = arith.constant 0 : i32
    %c0_i32_1 = arith.constant 0 : i32
    return %c0_i32, %c0_i32_0 : i32, i32
  }
  func.func @transform_3(%arg0: i32) -> (i32, i32) {
    %c0_i32 = arith.constant 0 : i32
    %c0_i32_0 = arith.constant 0 : i32
    %c0_i32_1 = arith.constant 0 : i32
    return %c0_i32, %c0_i32_0 : i32, i32
  }
  func.func @transform_4(%arg0: i32) -> (i32, i32) {
    %c0_i32 = arith.constant 0 : i32
    %c0_i32_0 = arith.constant 0 : i32
    %c0_i32_1 = arith.constant 0 : i32
    return %c0_i32, %c0_i32_0 : i32, i32
  }
  func.func @transform_5(%arg0: i32) -> (i32, i32) {
    %c0_i32 = arith.constant 0 : i32
    %c0_i32_0 = arith.constant 0 : i32
    return %arg0, %c0_i32 : i32, i32
  }
}

</mosaic_0001>

<bundles_post_ra>
// kernel: tpu_custom_call.1
= control target key start
LH: loop header
LB: loop body
LE: loop exit
PB: predicated region body
PF: predicated region fallthrough
CT: control target
= control target key end

     0   :  { %10 = vsyncpa [#allocation3], 0  ;;  %s804_s0 = inlined_call_operand.hbm [shape: bf16[8,128], index: 0, kind: input, shape index: {}]   ;;  %s805_s1 = inlined_call_operand.hbm [shape: bf16[128,128], index: 1, kind: input, shape index: {}]   ;;  %s806_s2 = inlined_call_operand.hbm [shape: bf16[128,128], index: 2, kind: input, shape index: {}]   ;;  %s807_s3 = inlined_call_operand.hbm [shape: bf16[128,128], index: 3, kind: input, shape index: {}]   ;;  %s808_s4 = inlined_call_operand.hbm [shape: f32[8,128], index: 4, kind: input, shape index: {}]   ;;  %s809_s5 = inlined_call_operand.hbm [shape: f32[8,128], index: 5, kind: output, shape index: {}]  }
   0x1   :  { %11 = vsyncpa [#allocation6], 0 }
   0x2   :  { %12 = vsyncpa [#allocation9], 0 }
   0x3   :  { %13 = vsyncpa [#allocation4], 0  ;;  %s707_s18 = smov [#allocation5]  }
   0x4   :  { %s29_s19 = sshll.u32 %s707_s18, 4  ;;  %s30_s19 = int_to_ptr.vmem [resolvable:$true] %s29_s19 }
   0x5   :  { %s587_s20 = scalar_lea.vmem %s30_s19, 1024  ;;  %p592_p1 = scmp.lt.s32.totalorder %s30_s19, %s30_s19 }
   0x6   :  { %p588_p0 = scmp.ne.s32.totalorder %s30_s19, %s587_s20  ;;  %p593_p2 = scmp.lt.s32.totalorder %s587_s20, %s587_s20 }
   0x8   :  { %p594_p3 = por %p593_p2, %p592_p1 }
   0xa   :  { %p595_p4 = pnand %p594_p3, %p588_p0 }
   0xc   :  { %598 = shalt.err (!%p595_p4)
}
   0xd   :  { %s708_s21 = smov 64   ;;  %s709_s22 = smov 4  }
   0xe   :  { %35 = dma.hbm_to_vmem [thread:$0]  %s805_s1, 1024, %s30_s19, [#allocation6], %s708_s21, %s708_s21, %s709_s22  }
   0xf   :  { %s710_s25 = smov [#allocation8]   ;;  %s711_s27 = smov [#allocation2]  }
  0x10   :  { %s53_s26 = sshll.u32 %s710_s25, 4  ;;  %s20_s28 = sshll.u32 %s711_s27, 4  ;;  %s54_s26 = int_to_ptr.vmem [resolvable:$true] %s53_s26  ;;  %s21_s28 = int_to_ptr.vmem [resolvable:$true] %s20_s28 }
  0x11   :  { %s607_s29 = scalar_lea.vmem %s54_s26, 1024  ;;  %p612_p6 = scmp.lt.s32.totalorder %s54_s26, %s54_s26 }
  0x12   :  { %p608_p5 = scmp.ne.s32.totalorder %s54_s26, %s607_s29  ;;  %p613_p7 = scmp.lt.s32.totalorder %s607_s29, %s607_s29 }
  0x14   :  { %p614_p8 = por %p613_p7, %p612_p6 }
  0x16   :  { %p615_p9 = pnand %p614_p8, %p608_p5 }
  0x18   :  { %618 = shalt.err (!%p615_p9)
}
  0x19   :  { %59 = dma.hbm_to_vmem [thread:$0]  %s807_s3, 1024, %s54_s26, [#allocation9], %s708_s21, %s708_s21, %s709_s22  }
  0x1a   :  { %s627_s1 = scalar_lea.vmem %s21_s28, 64  ;;  %p632_p11 = scmp.lt.s32.totalorder %s21_s28, %s21_s28 }
  0x1b   :  { %p628_p10 = scmp.ne.s32.totalorder %s21_s28, %s627_s1  ;;  %p633_p12 = scmp.lt.s32.totalorder %s627_s1, %s627_s1 }
  0x1d   :  { %p634_p13 = por %p633_p12, %p632_p11 }
  0x1f   :  { %p635_p0 = pnand %p634_p13, %p628_p10 }
  0x21   :  { %638 = shalt.err (!%p635_p0)
}
  0x22   :  { %23 = dma.hbm_to_vmem [thread:$0]  %s804_s0, 64, %s21_s28, [#allocation3]  }
  0x23   :  { %s712_s9 = smov [#allocation7]   ;;  %s713_s11 = smov [#allocation10]  }
  0x24   :  { %s41_s10 = sshll.u32 %s712_s9, 4  ;;  %s66_s12 = sshll.u32 %s713_s11, 4  ;;  %s42_s10 = int_to_ptr.vmem [resolvable:$true] %s41_s10  ;;  %s67_s12 = int_to_ptr.vmem [resolvable:$true] %s66_s12 }
  0x25   :  { %s647_s13 = scalar_lea.vmem %s42_s10, 1024  ;;  %p652_p2 = scmp.lt.s32.totalorder %s42_s10, %s42_s10 }
  0x26   :  { %p648_p1 = scmp.ne.s32.totalorder %s42_s10, %s647_s13  ;;  %p653_p3 = scmp.lt.s32.totalorder %s647_s13, %s647_s13 }
  0x28   :  { %p654_p4 = por %p653_p3, %p652_p2 }
  0x2a   :  { %p655_p5 = pnand %p654_p4, %p648_p1 }
  0x2c   :  { %658 = shalt.err (!%p655_p5)
}
  0x2d   :  { %47 = dma.hbm_to_vmem [thread:$0]  %s806_s2, 1024, %s42_s10, [#allocation6], %s708_s21, %s708_s21, %s709_s22  }
  0x2e   :  { %s667_s0 = scalar_lea.vmem %s67_s12, 128  ;;  %p672_p7 = scmp.lt.s32.totalorder %s67_s12, %s67_s12 }
  0x2f   :  { %p668_p6 = scmp.ne.s32.totalorder %s67_s12, %s667_s0  ;;  %p673_p8 = scmp.lt.s32.totalorder %s667_s0, %s667_s0 }
  0x31   :  { %p674_p9 = por %p673_p8, %p672_p7 }
  0x33   :  { %p675_p10 = pnand %p674_p9, %p668_p6 }
  0x35   :  { %678 = shalt.err (!%p675_p10)
}
  0x36   :  { %69 = dma.hbm_to_vmem [thread:$0]  %s808_s4, 128, %s67_s12, [#allocation9]  }
  0x37   :  { %699 = dma.done.wait [#allocation3], 64  }
  0x38   :  { %700 = vsyncadd [#allocation3], 4294967232 }
  0x39   :  { %701 = dma.done.wait [#allocation6], 2048  }
  0x3a   :  { %702 = vsyncadd [#allocation6], 4294965248 }
  0x3b   :  { %703 = dma.done.wait [#allocation9], 1152  }
  0x3c   :  { %704 = vsyncadd [#allocation9], 4294966144  ;;  %v714_v0 = vmov 0.0   ;;  %vm715_vm0 = vmmov 0   ;;  %v555_v1 = vld [vmem:[#allocation5 + $0x38] sm:$0xff]   ;;  %v556_v2 = vld [vmem:[#allocation5 + $0x30] sm:$0xff]   ;;  %v104_v24 = vlaneseq }
  0x3d   :  { %485 = vmatprep.subr.bf16.mxu0 %v714_v0  ;;  %501 = vmatprep.mubr.msk.bf16.mxu0 %vm715_vm0, %v714_v0  ;;  %v557_v3 = vld [vmem:[#allocation5 + $0x28] sm:$0xff]   ;;  %v563_v4 = vld [vmem:[#allocation7 + $0x38] sm:$0xff]   ;;  %v558_v5 = vld [vmem:[#allocation5 + $0x20] sm:$0xff]   ;;  %s716_s2 = smov [#allocation11]  }
  0x3e   :  { %505 = vmatprep.subr.bf16.mxu1 %v714_v0  ;;  %521 = vmatprep.mubr.msk.bf16.mxu1 %vm715_vm0, %v714_v0  ;;  %v564_v6 = vld [vmem:[#allocation7 + $0x30] sm:$0xff]   ;;  %v559_v7 = vld [vmem:[#allocation5 + $0x18] sm:$0xff]   ;;  %v565_v8 = vld [vmem:[#allocation7 + $0x28] sm:$0xff]   ;;  %v105_v25 = vshrl.u32 %v104_v24, 7  ;;  %s423_s4 = sshll.u32 %s716_s2, 4  ;;  %s424_s4 = int_to_ptr.vmem [resolvable:$true] %s423_s4 }
  0x3f   :  { %486 = vmatpush3.bf16.msra.mxu0 %v555_v1  ;;  %506 = vmatpush3.bf16.msra.mxu1 %v563_v4  ;;  %v560_v9 = vld [vmem:[#allocation5 + $0x10] sm:$0xff]   ;;  %v566_v10 = vld [vmem:[#allocation7 + $0x20] sm:$0xff]   ;;  %v561_v11 = vld [vmem:[#allocation5 + $0x8] sm:$0xff]   ;;  %s679_s17 = scalar_lea.vmem %s424_s4, 128  ;;  %p684_p12 = scmp.lt.s32.totalorder %s424_s4, %s424_s4 }
  0x40   :  { %487 = vmatprep.subr.bf16.mxu0 %v714_v0  ;;  %507 = vmatprep.subr.bf16.mxu1 %v714_v0  ;;  %v567_v12 = vld [vmem:[#allocation7 + $0x18] sm:$0xff]   ;;  %v562_v13 = vld [vmem:[#allocation5] sm:$0xff]   ;;  %v568_v14 = vld [vmem:[#allocation7 + $0x10] sm:$0xff]   ;;  %v106_v26 = vsub.s32 0, %v105_v25  ;;  %v216_v38 = vsub.s32 1, %v105_v25  ;;  %v326_v47 = vsub.s32 2, %v105_v25  ;;  %p680_p11 = scmp.ne.s32.totalorder %s424_s4, %s679_s17  ;;  %p685_p13 = scmp.lt.s32.totalorder %s679_s17, %s679_s17 }
  0x41   :  { %v86_v15 = vld [vmem:[#allocation2] sm:$0xf]  ;;  %v569_v16 = vld [vmem:[#allocation7 + $0x8] sm:$0xff]   ;;  %v570_v17 = vld [vmem:[#allocation7] sm:$0xff]  }
  0x42   :  { %v571_v18 = vld [vmem:[#allocation8 + $0x38] sm:$0xff]   ;;  %v572_v19 = vld [vmem:[#allocation8 + $0x30] sm:$0xff]   ;;  %v573_v20 = vld [vmem:[#allocation8 + $0x28] sm:$0xff]   ;;  %p686_p0 = por %p685_p13, %p684_p12 }
  0x43   :  { %488 = vmatpush3.bf16.msra.mxu0 %v556_v2  ;;  %508 = vmatpush3.bf16.msra.mxu1 %v564_v6  ;;  %v574_v21 = vld [vmem:[#allocation8 + $0x20] sm:$0xff]   ;;  %v575_v22 = vld [vmem:[#allocation8 + $0x18] sm:$0xff]   ;;  %v576_v23 = vld [vmem:[#allocation8 + $0x10] sm:$0xff]  }
  0x44   :  { %489 = vmatprep.subr.bf16.mxu0 %v714_v0  ;;  %509 = vmatprep.subr.bf16.mxu1 %v714_v0  ;;  %v87_v27 = vld [vmem:[#allocation10] sm:$0xff]  ;;  %v577_v36 = vld [vmem:[#allocation8 + $0x8] sm:$0xff]   ;;  %p687_p1 = pnand %p686_p0, %p680_p11 }
  0x45   :  { %v107_v28 = vrot.slane %v87_v27, %v106_v26  ;;  %v578_v37 = vld [vmem:[#allocation8] sm:$0xff]   ;;  %v217_v39 = vrot.slane %v87_v27, %v216_v38  ;;  %v327_v48 = vrot.slane %v87_v27, %v326_v47 }
  0x47   :  { %490 = vmatpush3.bf16.msra.mxu0 %v557_v3  ;;  %510 = vmatpush3.bf16.msra.mxu1 %v565_v8 }
  0x48   :  { %491 = vmatprep.subr.bf16.mxu0 %v714_v0  ;;  %511 = vmatprep.subr.bf16.mxu1 %v714_v0 }
  0x4b   :  { %492 = vmatpush3.bf16.msra.mxu0 %v558_v5  ;;  %512 = vmatpush3.bf16.msra.mxu1 %v566_v10 }
  0x4c   :  { %493 = vmatprep.subr.bf16.mxu0 %v714_v0  ;;  %513 = vmatprep.subr.bf16.mxu1 %v714_v0 }
  0x4f   :  { %494 = vmatpush3.bf16.msra.mxu0 %v559_v7  ;;  %514 = vmatpush3.bf16.msra.mxu1 %v567_v12 }
  0x50   :  { %495 = vmatprep.subr.bf16.mxu0 %v714_v0  ;;  %515 = vmatprep.subr.bf16.mxu1 %v714_v0 }
  0x53   :  { %496 = vmatpush3.bf16.msra.mxu0 %v560_v9  ;;  %516 = vmatpush3.bf16.msra.mxu1 %v568_v14 }
  0x54   :  { %497 = vmatprep.subr.bf16.mxu0 %v714_v0  ;;  %517 = vmatprep.subr.bf16.mxu1 %v714_v0 }
  0x57   :  { %498 = vmatpush3.bf16.msra.mxu0 %v561_v11  ;;  %518 = vmatpush3.bf16.msra.mxu1 %v569_v16 }
  0x58   :  { %499 = vmatprep.subr.bf16.mxu0 %v714_v0  ;;  %519 = vmatprep.subr.bf16.mxu1 %v714_v0 }
  0x5b   :  { %500 = vmatpush3.bf16.msra.mxu0 %v562_v13  ;;  %520 = vmatpush3.bf16.msra.mxu1 %v570_v17 }
  0x5c   :  { %525 = vmatprep.subr.bf16.mxu0 %v714_v0 }
  0x5e   :  { %502 = vmatmul.mubr.bf16.vlgmr.msra.gmra.mxu0 %v86_v15 }
  0x5f   :  { %541 = vmatprep.mubr.msk.bf16.mxu0 %vm715_vm0, %v714_v0  ;;  %526 = vmatpush3.bf16.msra.mxu0 %v571_v18 }
  0x60   :  { %527 = vmatprep.subr.bf16.mxu0 %v714_v0 }
  0x63   :  { %528 = vmatpush3.bf16.msra.mxu0 %v572_v19 }
  0x64   :  { %529 = vmatprep.subr.bf16.mxu0 %v714_v0 }
  0x67   :  { %530 = vmatpush3.bf16.msra.mxu0 %v573_v20 }
  0x68   :  { %531 = vmatprep.subr.bf16.mxu0 %v714_v0 }
  0x6b   :  { %532 = vmatpush3.bf16.msra.mxu0 %v574_v21 }
  0x6c   :  { %533 = vmatprep.subr.bf16.mxu0 %v714_v0 }
  0x6f   :  { %534 = vmatpush3.bf16.msra.mxu0 %v575_v22 }
  0x70   :  { %535 = vmatprep.subr.bf16.mxu0 %v714_v0 }
  0x73   :  { %536 = vmatpush3.bf16.msra.mxu0 %v576_v23 }
  0x74   :  { %537 = vmatprep.subr.bf16.mxu0 %v714_v0 }
  0x77   :  { %538 = vmatpush3.bf16.msra.mxu0 %v577_v36 }
  0x78   :  { %539 = vmatprep.subr.bf16.mxu0 %v714_v0 }
  0x7b   :  { %540 = vmatpush3.bf16.msra.mxu0 %v578_v37 }
 0x11e   :  { %v190_v29 = vpop.f32.mrf.mxu0 }
 0x11f   :  { %v191_v30 = vadd.f32 %v190_v29, %v107_v28 }
 0x120   :  { %v503_v31 = vpop.f32.mrf.mxu0 }
 0x121   :  { %v196_v32 = vmax.f32 %v191_v30, 0.0 }
 0x122   :  { %v193_v33 = vpop.f32.mrf.mxu0 }
 0x123   :  { %v197_v34 = vpack.c.bf16 %v196_v32, %v196_v32 }
 0x124   :  { %v504_v35 = vpop.f32.mrf.mxu0 }
 0x125   :  { %522 = vmatmul.mubr.bf16.vlgmr.msra.gmra.mxu1 %v197_v34 }
 0x1e5   :  { %v300_v40 = vpop.f32.mrf.mxu1 }
 0x1e6   :  { %v301_v41 = vadd.f32 %v300_v40, %v217_v39 }
 0x1e7   :  { %v523_v42 = vpop.f32.mrf.mxu1 }
 0x1e8   :  { %v306_v43 = vmax.f32 %v301_v41, 0.0 }
 0x1e9   :  { %v303_v44 = vpop.f32.mrf.mxu1 }
 0x1ea   :  { %v307_v45 = vpack.c.bf16 %v306_v43, %v306_v43 }
 0x1eb   :  { %v524_v46 = vpop.f32.mrf.mxu1 }
 0x1ec   :  { %542 = vmatmul.mubr.bf16.vlgmr.msra.gmra.mxu0 %v307_v45 }
 0x2ac   :  { %v410_v49 = vpop.f32.mrf.mxu0 }
 0x2ad   :  { %v411_v50 = vadd.f32 %v410_v49, %v327_v48 }
 0x2ae   :  { %v543_v51 = vpop.f32.mrf.mxu0 }
 0x2af   :  { %416 = vst [vmem:[#allocation11] sm:$0xff] %v411_v50 }
 0x2b0   :  { %v413_v52 = vpop.f32.mrf.mxu0 }
 0x2b1   :  { %690 = shalt.err (!%p687_p1)
}
 0x2b2   :  { %426 = dma.vmem_to_hbm [thread:$0]  %s424_s4, 128, %s809_s5, [#allocation4]   ;;  %v544_v53 = vpop.f32.mrf.mxu0 }
 0x2b3   :  { %705 = dma.done.wait [#allocation4], 128  }
 0x2b4   :  { %706 = vsyncadd [#allocation4], 4294967168 }
 0x2b5   :  { %430 = vsyncpa [#allocation3], 1 }
 0x2b6   :  { %431 = vsyncpa [#allocation6], 1 }
 0x2b7   :  { %432 = vsyncpa [#allocation9], 1 }
 0x2b8   :  { %433 = vsyncpa [#allocation4], 1 }

</bundles_post_ra>
